<compile_context>
chip_gen: v6e
topology: v6e:2x2x1
jax: 0.10.0
libtpu: 0.0.40
codegen_flags: <defaults>
</compile_context>

<pallas_src>
import jax
import jax.numpy as jnp
from jax.experimental import pallas as pl
from jax.experimental.pallas import tpu as pltpu

INP = 20
OUT = 50
PAD = 128          # lane width: all feature / contraction dims padded to this
N_LAYERS = 10
BM_CAP = 256       # max batch-tile rows (sublane-aligned)

# (in_f, out_f) of the 10 nn.Linear layers in execution order.
LAYER_DIMS = [
    (INP, 10), (10, 15),        # lin_1
    (15, 10), (10, 7),          # lin_2
    (7, 7),                     # linear (followed by self.act = ReLU)
    (7, 10), (10, 15),          # lin_3
    (15, 10), (10, 20),         # lin_4
    (20, OUT),                  # linear1
]


def mymodel8_kernel(x_ref, w_ref, b_ref, o_ref):
    """Whole residual-MLP chain for one batch tile.

    x_ref : (bm, 128)        zero-padded activations (first INP lanes valid)
    w_ref : (10, 128, 128)   packed, pre-transposed (in,out), zero-padded
    b_ref : (10, 1, 128)     packed, zero-padded biases
    o_ref : (bm, 128)        padded output (first OUT lanes valid)
    """
    def layer(h, i, relu=True):
        # Static index i -> squeezed (128,128) weight tile; no relayout.
        y = jnp.dot(h, w_ref[i], preferred_element_type=jnp.float32) + b_ref[i]
        return jnp.maximum(y, 0.0) if relu else y

    h = x_ref[...]
    h = layer(h, 0)
    x1 = layer(h, 1)             # lin_1 output (15 valid lanes, rest 0)
    h = layer(x1, 2)
    x2 = layer(h, 3)             # lin_2 output (7 valid lanes, rest 0)
    h = layer(x2, 4)             # self.act(self.linear(x2))
    h = layer(h + x2, 5)         # skip add stays zero in padded lanes
    h = layer(h, 6)              # lin_3 output
    h = layer(h + x1, 7)
    h = layer(h, 8)              # lin_4 output
    h = layer(h, 9, relu=False)  # linear1 (no ReLU)
    o_ref[...] = h.astype(o_ref.dtype)


def _round_up(n, m):
    return ((n + m - 1) // m) * m


@jax.jit
def mymodel8_forward(x, w_packed, b_packed):
    batch = x.shape[0]
    bm = min(_round_up(batch, 8), BM_CAP)    # sublane-aligned batch tile
    batch_pad = _round_up(batch, bm)

    # Zero-pad activations to a lane-dense (batch_pad, 128) slab.
    x_p = jnp.zeros((batch_pad, PAD), jnp.float32)
    x_p = x_p.at[:batch, :INP].set(x.astype(jnp.float32))

    out_p = pl.pallas_call(
        mymodel8_kernel,
        out_shape=jax.ShapeDtypeStruct((batch_pad, PAD), jnp.float32),
        grid_spec=pltpu.PrefetchScalarGridSpec(
            num_scalar_prefetch=0,
            grid=(batch_pad // bm,),
            in_specs=[
                pl.BlockSpec((bm, PAD), lambda i: (i, 0)),                # x tile
                pl.BlockSpec((N_LAYERS, PAD, PAD), lambda i: (0, 0, 0)),  # packed W (resident)
                pl.BlockSpec((N_LAYERS, 1, PAD), lambda i: (0, 0, 0)),    # packed b (resident)
            ],
            out_specs=pl.BlockSpec((bm, PAD), lambda i: (i, 0)),
        ),
        compiler_params=pltpu.CompilerParams(
            dimension_semantics=("parallel",)),   # megacore sharding on v7x
    )(x_p, w_packed, b_packed)

    return out_p[:batch, :OUT]


def init_params(key):
    """Deterministic nn.Linear-style init: U(-1/sqrt(fan_in), 1/sqrt(fan_in)).

    Weights kept in PyTorch (out_f, in_f) layout; packing transposes once.
    """
    params = []
    for (in_f, out_f) in LAYER_DIMS:
        key, kw, kb = jax.random.split(key, 3)
        bound = 1.0 / (in_f ** 0.5)
        w = jax.random.uniform(kw, (out_f, in_f), jnp.float32, -bound, bound)
        b = jax.random.uniform(kb, (out_f,), jnp.float32, -bound, bound)
        params.append((w, b))
    return params


def pack_params(params):
    """One-time host cost: pre-transpose, zero-pad and stack all params."""
    w_blocks, b_blocks = [], []
    for (w, b) in params:
        out_f, in_f = w.shape
        wt = jnp.zeros((PAD, PAD), jnp.float32).at[:in_f, :out_f].set(w.T)
        bp = jnp.zeros((1, PAD), jnp.float32).at[0, :out_f].set(b)
        w_blocks.append(wt)
        b_blocks.append(bp)
    return jnp.stack(w_blocks), jnp.stack(b_blocks)


def reference_forward(x, params):
    """Pure-JAX reference mirroring MyModel8.forward exactly."""
    def lin(h, i, relu=True):
        w, b = params[i]
        y = h @ w.T + b
        return jnp.maximum(y, 0.0) if relu else y

    x1 = lin(lin(x, 0), 1)
    x2 = lin(lin(x1, 2), 3)
    h = lin(x2, 4)
    h = lin(lin(h + x2, 5), 6)
    h = lin(lin(h + x1, 7), 8)
    return lin(h, 9, relu=False)


if __name__ == "__main__":
    key = jax.random.PRNGKey(0)
    key, kx = jax.random.split(key)

    batch = 8
    x = jax.random.uniform(kx, (batch, INP), jnp.float32)   # (8, 20)

    params = init_params(key)
    w_packed, b_packed = pack_params(params)     # (10,128,128), (10,1,128)

    out = mymodel8_forward(x, w_packed, b_packed)
    out = jax.block_until_ready(out)

    ref = reference_forward(x, params)
    assert out.shape == (batch, OUT)
    assert jnp.allclose(out, ref, atol=1e-4, rtol=1e-4), "mismatch vs reference"

    print("KERNEL_OK")
</pallas_src>

<mosaic_0001>
module attributes {stable_mosaic.version = 11 : i64} {
  func.func @mymodel8_kernel(%arg0: i32, %arg1: memref<8x128xf32, #tpu.memory_space<vmem>>, %arg2: memref<10x128x128xf32, #tpu.memory_space<vmem>>, %arg3: memref<10x1x128xf32, #tpu.memory_space<vmem>>, %arg4: memref<8x128xf32, #tpu.memory_space<vmem>>) attributes {dimension_semantics = [#tpu.dimension_semantics<parallel>], iteration_bounds = array<i64: 1>, scalar_prefetch = 0 : i64, scratch_operands = 0 : i64, tpu.core_type = #tpu.core_type<tc>, window_params = [{transform_indices = @transform_0, window_bounds = array<i64: 8, 128>}, {pipeline_mode = #tpu.pipeline_mode<synchronous>, transform_indices = @transform_1, window_bounds = array<i64: 10, 128, 128>}, {pipeline_mode = #tpu.pipeline_mode<synchronous>, transform_indices = @transform_2, window_bounds = array<i64: 10, 1, 128>}, {transform_indices = @transform_3, window_bounds = array<i64: 8, 128>}]} {
    %c0 = arith.constant 0 : index
    %c0_0 = arith.constant 0 : index
    %0 = vector.load %arg1[%c0, %c0_0] : memref<8x128xf32, #tpu.memory_space<vmem>>, vector<8x128xf32>
    %c0_1 = arith.constant 0 : index
    %c0_2 = arith.constant 0 : index
    %c0_3 = arith.constant 0 : index
    %1 = vector.load %arg2[%c0_1, %c0_2, %c0_3] : memref<10x128x128xf32, #tpu.memory_space<vmem>>, vector<1x128x128xf32>
    %2 = vector.shape_cast %1 : vector<1x128x128xf32> to vector<128x128xf32>
    %cst = arith.constant dense<0.000000e+00> : vector<8x128xf32>
    %3 = tpu.matmul %0, %2, %cst {dimension_numbers = #tpu.dot_dimension_numbers<[1], [0], [0], [1], [0, 0, 1, 1], [], []>} : vector<8x128xf32>, vector<128x128xf32>, vector<8x128xf32> -> vector<8x128xf32>
    %c0_4 = arith.constant 0 : index
    %c0_5 = arith.constant 0 : index
    %c0_6 = arith.constant 0 : index
    %4 = vector.load %arg3[%c0_4, %c0_5, %c0_6] : memref<10x1x128xf32, #tpu.memory_space<vmem>>, vector<1x1x128xf32>
    %5 = vector.shape_cast %4 : vector<1x1x128xf32> to vector<1x128xf32>
    %6 = vector.broadcast %5 : vector<1x128xf32> to vector<8x128xf32>
    %7 = arith.addf %3, %6 : vector<8x128xf32>
    %cst_7 = arith.constant 0.000000e+00 : f32
    %8 = vector.broadcast %cst_7 : f32 to vector<8x128xf32>
    %9 = arith.maximumf %7, %8 : vector<8x128xf32>
    %c1 = arith.constant 1 : index
    %c0_8 = arith.constant 0 : index
    %c0_9 = arith.constant 0 : index
    %10 = vector.load %arg2[%c1, %c0_8, %c0_9] : memref<10x128x128xf32, #tpu.memory_space<vmem>>, vector<1x128x128xf32>
    %11 = vector.shape_cast %10 : vector<1x128x128xf32> to vector<128x128xf32>
    %cst_10 = arith.constant dense<0.000000e+00> : vector<8x128xf32>
    %12 = tpu.matmul %9, %11, %cst_10 {dimension_numbers = #tpu.dot_dimension_numbers<[1], [0], [0], [1], [0, 0, 1, 1], [], []>} : vector<8x128xf32>, vector<128x128xf32>, vector<8x128xf32> -> vector<8x128xf32>
    %c1_11 = arith.constant 1 : index
    %c0_12 = arith.constant 0 : index
    %c0_13 = arith.constant 0 : index
    %13 = vector.load %arg3[%c1_11, %c0_12, %c0_13] : memref<10x1x128xf32, #tpu.memory_space<vmem>>, vector<1x1x128xf32>
    %14 = vector.shape_cast %13 : vector<1x1x128xf32> to vector<1x128xf32>
    %15 = vector.broadcast %14 : vector<1x128xf32> to vector<8x128xf32>
    %16 = arith.addf %12, %15 : vector<8x128xf32>
    %cst_14 = arith.constant 0.000000e+00 : f32
    %17 = vector.broadcast %cst_14 : f32 to vector<8x128xf32>
    %18 = arith.maximumf %16, %17 : vector<8x128xf32>
    %c2 = arith.constant 2 : index
    %c0_15 = arith.constant 0 : index
    %c0_16 = arith.constant 0 : index
    %19 = vector.load %arg2[%c2, %c0_15, %c0_16] : memref<10x128x128xf32, #tpu.memory_space<vmem>>, vector<1x128x128xf32>
    %20 = vector.shape_cast %19 : vector<1x128x128xf32> to vector<128x128xf32>
    %cst_17 = arith.constant dense<0.000000e+00> : vector<8x128xf32>
    %21 = tpu.matmul %18, %20, %cst_17 {dimension_numbers = #tpu.dot_dimension_numbers<[1], [0], [0], [1], [0, 0, 1, 1], [], []>} : vector<8x128xf32>, vector<128x128xf32>, vector<8x128xf32> -> vector<8x128xf32>
    %c2_18 = arith.constant 2 : index
    %c0_19 = arith.constant 0 : index
    %c0_20 = arith.constant 0 : index
    %22 = vector.load %arg3[%c2_18, %c0_19, %c0_20] : memref<10x1x128xf32, #tpu.memory_space<vmem>>, vector<1x1x128xf32>
    %23 = vector.shape_cast %22 : vector<1x1x128xf32> to vector<1x128xf32>
    %24 = vector.broadcast %23 : vector<1x128xf32> to vector<8x128xf32>
    %25 = arith.addf %21, %24 : vector<8x128xf32>
    %cst_21 = arith.constant 0.000000e+00 : f32
    %26 = vector.broadcast %cst_21 : f32 to vector<8x128xf32>
    %27 = arith.maximumf %25, %26 : vector<8x128xf32>
    %c3 = arith.constant 3 : index
    %c0_22 = arith.constant 0 : index
    %c0_23 = arith.constant 0 : index
    %28 = vector.load %arg2[%c3, %c0_22, %c0_23] : memref<10x128x128xf32, #tpu.memory_space<vmem>>, vector<1x128x128xf32>
    %29 = vector.shape_cast %28 : vector<1x128x128xf32> to vector<128x128xf32>
    %cst_24 = arith.constant dense<0.000000e+00> : vector<8x128xf32>
    %30 = tpu.matmul %27, %29, %cst_24 {dimension_numbers = #tpu.dot_dimension_numbers<[1], [0], [0], [1], [0, 0, 1, 1], [], []>} : vector<8x128xf32>, vector<128x128xf32>, vector<8x128xf32> -> vector<8x128xf32>
    %c3_25 = arith.constant 3 : index
    %c0_26 = arith.constant 0 : index
    %c0_27 = arith.constant 0 : index
    %31 = vector.load %arg3[%c3_25, %c0_26, %c0_27] : memref<10x1x128xf32, #tpu.memory_space<vmem>>, vector<1x1x128xf32>
    %32 = vector.shape_cast %31 : vector<1x1x128xf32> to vector<1x128xf32>
    %33 = vector.broadcast %32 : vector<1x128xf32> to vector<8x128xf32>
    %34 = arith.addf %30, %33 : vector<8x128xf32>
    %cst_28 = arith.constant 0.000000e+00 : f32
    %35 = vector.broadcast %cst_28 : f32 to vector<8x128xf32>
    %36 = arith.maximumf %34, %35 : vector<8x128xf32>
    %c4 = arith.constant 4 : index
    %c0_29 = arith.constant 0 : index
    %c0_30 = arith.constant 0 : index
    %37 = vector.load %arg2[%c4, %c0_29, %c0_30] : memref<10x128x128xf32, #tpu.memory_space<vmem>>, vector<1x128x128xf32>
    %38 = vector.shape_cast %37 : vector<1x128x128xf32> to vector<128x128xf32>
    %cst_31 = arith.constant dense<0.000000e+00> : vector<8x128xf32>
    %39 = tpu.matmul %36, %38, %cst_31 {dimension_numbers = #tpu.dot_dimension_numbers<[1], [0], [0], [1], [0, 0, 1, 1], [], []>} : vector<8x128xf32>, vector<128x128xf32>, vector<8x128xf32> -> vector<8x128xf32>
    %c4_32 = arith.constant 4 : index
    %c0_33 = arith.constant 0 : index
    %c0_34 = arith.constant 0 : index
    %40 = vector.load %arg3[%c4_32, %c0_33, %c0_34] : memref<10x1x128xf32, #tpu.memory_space<vmem>>, vector<1x1x128xf32>
    %41 = vector.shape_cast %40 : vector<1x1x128xf32> to vector<1x128xf32>
    %42 = vector.broadcast %41 : vector<1x128xf32> to vector<8x128xf32>
    %43 = arith.addf %39, %42 : vector<8x128xf32>
    %cst_35 = arith.constant 0.000000e+00 : f32
    %44 = vector.broadcast %cst_35 : f32 to vector<8x128xf32>
    %45 = arith.maximumf %43, %44 : vector<8x128xf32>
    %46 = arith.addf %45, %36 : vector<8x128xf32>
    %c5 = arith.constant 5 : index
    %c0_36 = arith.constant 0 : index
    %c0_37 = arith.constant 0 : index
    %47 = vector.load %arg2[%c5, %c0_36, %c0_37] : memref<10x128x128xf32, #tpu.memory_space<vmem>>, vector<1x128x128xf32>
    %48 = vector.shape_cast %47 : vector<1x128x128xf32> to vector<128x128xf32>
    %cst_38 = arith.constant dense<0.000000e+00> : vector<8x128xf32>
    %49 = tpu.matmul %46, %48, %cst_38 {dimension_numbers = #tpu.dot_dimension_numbers<[1], [0], [0], [1], [0, 0, 1, 1], [], []>} : vector<8x128xf32>, vector<128x128xf32>, vector<8x128xf32> -> vector<8x128xf32>
    %c5_39 = arith.constant 5 : index
    %c0_40 = arith.constant 0 : index
    %c0_41 = arith.constant 0 : index
    %50 = vector.load %arg3[%c5_39, %c0_40, %c0_41] : memref<10x1x128xf32, #tpu.memory_space<vmem>>, vector<1x1x128xf32>
    %51 = vector.shape_cast %50 : vector<1x1x128xf32> to vector<1x128xf32>
    %52 = vector.broadcast %51 : vector<1x128xf32> to vector<8x128xf32>
    %53 = arith.addf %49, %52 : vector<8x128xf32>
    %cst_42 = arith.constant 0.000000e+00 : f32
    %54 = vector.broadcast %cst_42 : f32 to vector<8x128xf32>
    %55 = arith.maximumf %53, %54 : vector<8x128xf32>
    %c6 = arith.constant 6 : index
    %c0_43 = arith.constant 0 : index
    %c0_44 = arith.constant 0 : index
    %56 = vector.load %arg2[%c6, %c0_43, %c0_44] : memref<10x128x128xf32, #tpu.memory_space<vmem>>, vector<1x128x128xf32>
    %57 = vector.shape_cast %56 : vector<1x128x128xf32> to vector<128x128xf32>
    %cst_45 = arith.constant dense<0.000000e+00> : vector<8x128xf32>
    %58 = tpu.matmul %55, %57, %cst_45 {dimension_numbers = #tpu.dot_dimension_numbers<[1], [0], [0], [1], [0, 0, 1, 1], [], []>} : vector<8x128xf32>, vector<128x128xf32>, vector<8x128xf32> -> vector<8x128xf32>
    %c6_46 = arith.constant 6 : index
    %c0_47 = arith.constant 0 : index
    %c0_48 = arith.constant 0 : index
    %59 = vector.load %arg3[%c6_46, %c0_47, %c0_48] : memref<10x1x128xf32, #tpu.memory_space<vmem>>, vector<1x1x128xf32>
    %60 = vector.shape_cast %59 : vector<1x1x128xf32> to vector<1x128xf32>
    %61 = vector.broadcast %60 : vector<1x128xf32> to vector<8x128xf32>
    %62 = arith.addf %58, %61 : vector<8x128xf32>
    %cst_49 = arith.constant 0.000000e+00 : f32
    %63 = vector.broadcast %cst_49 : f32 to vector<8x128xf32>
    %64 = arith.maximumf %62, %63 : vector<8x128xf32>
    %65 = arith.addf %64, %18 : vector<8x128xf32>
    %c7 = arith.constant 7 : index
    %c0_50 = arith.constant 0 : index
    %c0_51 = arith.constant 0 : index
    %66 = vector.load %arg2[%c7, %c0_50, %c0_51] : memref<10x128x128xf32, #tpu.memory_space<vmem>>, vector<1x128x128xf32>
    %67 = vector.shape_cast %66 : vector<1x128x128xf32> to vector<128x128xf32>
    %cst_52 = arith.constant dense<0.000000e+00> : vector<8x128xf32>
    %68 = tpu.matmul %65, %67, %cst_52 {dimension_numbers = #tpu.dot_dimension_numbers<[1], [0], [0], [1], [0, 0, 1, 1], [], []>} : vector<8x128xf32>, vector<128x128xf32>, vector<8x128xf32> -> vector<8x128xf32>
    %c7_53 = arith.constant 7 : index
    %c0_54 = arith.constant 0 : index
    %c0_55 = arith.constant 0 : index
    %69 = vector.load %arg3[%c7_53, %c0_54, %c0_55] : memref<10x1x128xf32, #tpu.memory_space<vmem>>, vector<1x1x128xf32>
    %70 = vector.shape_cast %69 : vector<1x1x128xf32> to vector<1x128xf32>
    %71 = vector.broadcast %70 : vector<1x128xf32> to vector<8x128xf32>
    %72 = arith.addf %68, %71 : vector<8x128xf32>
    %cst_56 = arith.constant 0.000000e+00 : f32
    %73 = vector.broadcast %cst_56 : f32 to vector<8x128xf32>
    %74 = arith.maximumf %72, %73 : vector<8x128xf32>
    %c8 = arith.constant 8 : index
    %c0_57 = arith.constant 0 : index
    %c0_58 = arith.constant 0 : index
    %75 = vector.load %arg2[%c8, %c0_57, %c0_58] : memref<10x128x128xf32, #tpu.memory_space<vmem>>, vector<1x128x128xf32>
    %76 = vector.shape_cast %75 : vector<1x128x128xf32> to vector<128x128xf32>
    %cst_59 = arith.constant dense<0.000000e+00> : vector<8x128xf32>
    %77 = tpu.matmul %74, %76, %cst_59 {dimension_numbers = #tpu.dot_dimension_numbers<[1], [0], [0], [1], [0, 0, 1, 1], [], []>} : vector<8x128xf32>, vector<128x128xf32>, vector<8x128xf32> -> vector<8x128xf32>
    %c8_60 = arith.constant 8 : index
    %c0_61 = arith.constant 0 : index
    %c0_62 = arith.constant 0 : index
    %78 = vector.load %arg3[%c8_60, %c0_61, %c0_62] : memref<10x1x128xf32, #tpu.memory_space<vmem>>, vector<1x1x128xf32>
    %79 = vector.shape_cast %78 : vector<1x1x128xf32> to vector<1x128xf32>
    %80 = vector.broadcast %79 : vector<1x128xf32> to vector<8x128xf32>
    %81 = arith.addf %77, %80 : vector<8x128xf32>
    %cst_63 = arith.constant 0.000000e+00 : f32
    %82 = vector.broadcast %cst_63 : f32 to vector<8x128xf32>
    %83 = arith.maximumf %81, %82 : vector<8x128xf32>
    %c9 = arith.constant 9 : index
    %c0_64 = arith.constant 0 : index
    %c0_65 = arith.constant 0 : index
    %84 = vector.load %arg2[%c9, %c0_64, %c0_65] : memref<10x128x128xf32, #tpu.memory_space<vmem>>, vector<1x128x128xf32>
    %85 = vector.shape_cast %84 : vector<1x128x128xf32> to vector<128x128xf32>
    %cst_66 = arith.constant dense<0.000000e+00> : vector<8x128xf32>
    %86 = tpu.matmul %83, %85, %cst_66 {dimension_numbers = #tpu.dot_dimension_numbers<[1], [0], [0], [1], [0, 0, 1, 1], [], []>} : vector<8x128xf32>, vector<128x128xf32>, vector<8x128xf32> -> vector<8x128xf32>
    %c9_67 = arith.constant 9 : index
    %c0_68 = arith.constant 0 : index
    %c0_69 = arith.constant 0 : index
    %87 = vector.load %arg3[%c9_67, %c0_68, %c0_69] : memref<10x1x128xf32, #tpu.memory_space<vmem>>, vector<1x1x128xf32>
    %88 = vector.shape_cast %87 : vector<1x1x128xf32> to vector<1x128xf32>
    %89 = vector.broadcast %88 : vector<1x128xf32> to vector<8x128xf32>
    %90 = arith.addf %86, %89 : vector<8x128xf32>
    %c0_70 = arith.constant 0 : index
    %c0_71 = arith.constant 0 : index
    %91 = vector.load %arg4[%c0_70, %c0_71] : memref<8x128xf32, #tpu.memory_space<vmem>>, vector<8x128xf32>
    tpu.vector_store %arg4[%c0_70, %c0_71], %90 {strides = array<i32>} : memref<8x128xf32, #tpu.memory_space<vmem>>, vector<8x128xf32>,
    return
  }
  func.func @transform_0(%arg0: i32) -> (i32, i32) {
    %c0_i32 = arith.constant 0 : i32
    %c0_i32_0 = arith.constant 0 : i32
    return %arg0, %c0_i32 : i32, i32
  }
  func.func @transform_1(%arg0: i32) -> (i32, i32, i32) {
    %c0_i32 = arith.constant 0 : i32
    %c0_i32_0 = arith.constant 0 : i32
    %c0_i32_1 = arith.constant 0 : i32
    %c0_i32_2 = arith.constant 0 : i32
    return %c0_i32, %c0_i32_0, %c0_i32_1 : i32, i32, i32
  }
  func.func @transform_2(%arg0: i32) -> (i32, i32, i32) {
    %c0_i32 = arith.constant 0 : i32
    %c0_i32_0 = arith.constant 0 : i32
    %c0_i32_1 = arith.constant 0 : i32
    %c0_i32_2 = arith.constant 0 : i32
    return %c0_i32, %c0_i32_0, %c0_i32_1 : i32, i32, i32
  }
  func.func @transform_3(%arg0: i32) -> (i32, i32) {
    %c0_i32 = arith.constant 0 : i32
    %c0_i32_0 = arith.constant 0 : i32
    return %arg0, %c0_i32 : i32, i32
  }
}

</mosaic_0001>

<bundles_post_ra>
// kernel: mymodel8_forward.1
= control target key start
LH: loop header
LB: loop body
LE: loop exit
PB: predicated region body
PF: predicated region fallthrough
CT: control target
= control target key end

     0   :  { %8 = vsyncpa [#allocation3], 0  ;;  %s1846_s0 = inlined_call_operand.vmem [shape: f32[8,128], index: 0, kind: input, shape index: {}]   ;;  %s1847_s1 = inlined_call_operand.hbm [shape: f32[10,128,128], index: 1, kind: input, shape index: {}]   ;;  %s1848_s2 = inlined_call_operand.vmem [shape: f32[10,1,128], index: 2, kind: input, shape index: {}]   ;;  %s1849_s3 = inlined_call_operand.hbm [shape: f32[8,128], index: 3, kind: output, shape index: {}]  }
   0x1   :  { %9 = vsyncpa [#allocation4], 0  ;;  %s1594_s12 = smov [#allocation2]  }
   0x2   :  { %s17_s13 = sshll.u32 %s1594_s12, 4  ;;  %s18_s13 = int_to_ptr.vmem [resolvable:$true] %s17_s13 }
   0x3   :  { %s1558_s14 = scalar_lea.vmem %s18_s13, 20480  ;;  %p1563_p1 = scmp.lt.s32.totalorder %s18_s13, %s18_s13 }
   0x4   :  { %p1559_p0 = scmp.ne.s32.totalorder %s18_s13, %s1558_s14  ;;  %p1564_p2 = scmp.lt.s32.totalorder %s1558_s14, %s1558_s14 }
   0x6   :  { %p1565_p3 = por %p1564_p2, %p1563_p1 }
   0x8   :  { %p1566_p4 = pnand %p1565_p3, %p1559_p0 }
   0xa   :  { %1569 = shalt.err (!%p1566_p4)
}
   0xb   :  { %s1595_s15 = smov 128   ;;  %s1596_s16 = smov 8  }
   0xc   :  { %23 = dma.hbm_to_vmem [thread:$0]  %s1847_s1, 20480, %s18_s13, [#allocation3], %s1595_s15, %s1595_s15, %s1596_s16  }
   0xd   :  { %1590 = dma.done.wait [#allocation3], 20480  }
   0xe   :  { %1591 = vsyncadd [#allocation3], 4294946816  ;;  %v1597_v0 = vmov 0.0   ;;  %vm1598_vm0 = vmmov 0   ;;  %v45_v1 = vld [vmem:[#allocation2 + $0x78] sm:$0xff]  ;;  %v44_v2 = vld [vmem:[#allocation2 + $0x70] sm:$0xff] }
   0xf   :  { %1194 = vmatprep.subr.mxu0 %v1597_v0  ;;  %1226 = vmatprep.mubr.msk.f32.mxu0 %vm1598_vm0, %v1597_v0  ;;  %v43_v3 = vld [vmem:[#allocation2 + $0x68] sm:$0xff]  ;;  %v42_v4 = vld [vmem:[#allocation2 + $0x60] sm:$0xff]  ;;  %v140_v5 = vld [vmem:[#allocation2 + $0xf8] sm:$0xff]  ;;  %s1599_s12 = smov [#allocation5]  }
  0x10   :  { %1229 = vmatprep.subr.mxu1 %v1597_v0  ;;  %1261 = vmatprep.mubr.msk.f32.mxu1 %vm1598_vm0, %v1597_v0  ;;  %v41_v6 = vld [vmem:[#allocation2 + $0x58] sm:$0xff]  ;;  %v139_v7 = vld [vmem:[#allocation2 + $0xf0] sm:$0xff]  ;;  %v138_v8 = vld [vmem:[#allocation2 + $0xe8] sm:$0xff]  ;;  %s996_s13 = sshll.u32 %s1599_s12, 4  ;;  %s997_s13 = int_to_ptr.vmem [resolvable:$true] %s996_s13 }
  0x11   :  { %1195 = vmatpush3.msra.mxu0 %v45_v1  ;;  %1230 = vmatpush3.msra.mxu1 %v140_v5  ;;  %v40_v9 = vld [vmem:[#allocation2 + $0x50] sm:$0xff]  ;;  %v137_v10 = vld [vmem:[#allocation2 + $0xe0] sm:$0xff]  ;;  %v39_v11 = vld [vmem:[#allocation2 + $0x48] sm:$0xff]  ;;  %s1570_s14 = scalar_lea.vmem %s997_s13, 128  ;;  %p1575_p6 = scmp.lt.s32.totalorder %s997_s13, %s997_s13 }
  0x12   :  { %1196 = vmatprep.subr.mxu0 %v1597_v0  ;;  %1231 = vmatprep.subr.mxu1 %v1597_v0  ;;  %v136_v12 = vld [vmem:[#allocation2 + $0xd8] sm:$0xff]  ;;  %v38_v13 = vld [vmem:[#allocation2 + $0x40] sm:$0xff]  ;;  %v135_v14 = vld [vmem:[#allocation2 + $0xd0] sm:$0xff]  ;;  %p1571_p5 = scmp.ne.s32.totalorder %s997_s13, %s1570_s14  ;;  %p1576_p7 = scmp.lt.s32.totalorder %s1570_s14, %s1570_s14 }
  0x13   :  { %1197 = vmatpush3.msra.mxu0 %v44_v2  ;;  %1232 = vmatpush3.msra.mxu1 %v139_v7  ;;  %v37_v15 = vld [vmem:[#allocation2 + $0x38] sm:$0xff]  ;;  %v134_v16 = vld [vmem:[#allocation2 + $0xc8] sm:$0xff]  ;;  %v36_v17 = vld [vmem:[#allocation2 + $0x30] sm:$0xff] }
  0x14   :  { %1198 = vmatprep.subr.mxu0 %v1597_v0  ;;  %1233 = vmatprep.subr.mxu1 %v1597_v0  ;;  %v133_v18 = vld [vmem:[#allocation2 + $0xc0] sm:$0xff]  ;;  %v35_v19 = vld [vmem:[#allocation2 + $0x28] sm:$0xff]  ;;  %v132_v20 = vld [vmem:[#allocation2 + $0xb8] sm:$0xff]  ;;  %p1577_p8 = por %p1576_p7, %p1575_p6 }
  0x15   :  { %1199 = vmatpush3.msra.mxu0 %v43_v3  ;;  %1234 = vmatpush3.msra.mxu1 %v138_v8  ;;  %v34_v21 = vld [vmem:[#allocation2 + $0x20] sm:$0xff]  ;;  %v131_v22 = vld [vmem:[#allocation2 + $0xb0] sm:$0xff]  ;;  %v33_v23 = vld [vmem:[#allocation2 + $0x18] sm:$0xff] }
  0x16   :  { %1200 = vmatprep.subr.mxu0 %v1597_v0  ;;  %1235 = vmatprep.subr.mxu1 %v1597_v0  ;;  %v130_v24 = vld [vmem:[#allocation2 + $0xa8] sm:$0xff]  ;;  %v32_v25 = vld [vmem:[#allocation2 + $0x10] sm:$0xff]  ;;  %v129_v26 = vld [vmem:[#allocation2 + $0xa0] sm:$0xff]  ;;  %p1578_p9 = pnand %p1577_p8, %p1571_p5 }
  0x17   :  { %1201 = vmatpush3.msra.mxu0 %v42_v4  ;;  %1236 = vmatpush3.msra.mxu1 %v137_v10  ;;  %v31_v27 = vld [vmem:[#allocation2 + $0x8] sm:$0xff]  ;;  %v128_v28 = vld [vmem:[#allocation2 + $0x98] sm:$0xff]  ;;  %v30_v29 = vld [vmem:[#allocation2] sm:$0xff] }
  0x18   :  { %1202 = vmatprep.subr.mxu0 %v1597_v0  ;;  %1237 = vmatprep.subr.mxu1 %v1597_v0  ;;  %v29_v30 = vld [vmem:[%s1846_s0] sm:$0xff]  ;;  %v127_v31 = vld [vmem:[#allocation2 + $0x90] sm:$0xff]  ;;  %v126_v32 = vld [vmem:[#allocation2 + $0x88] sm:$0xff] }
  0x19   :  { %1203 = vmatpush3.msra.mxu0 %v41_v6  ;;  %1238 = vmatpush3.msra.mxu1 %v136_v12  ;;  %v125_v33 = vld [vmem:[#allocation2 + $0x80] sm:$0xff]  ;;  %v236_v34 = vld [vmem:[#allocation2 + $0x178] sm:$0xff]  ;;  %v235_v35 = vld [vmem:[#allocation2 + $0x170] sm:$0xff] }
  0x1a   :  { %1204 = vmatprep.subr.mxu0 %v1597_v0  ;;  %1239 = vmatprep.subr.mxu1 %v1597_v0  ;;  %v234_v36 = vld [vmem:[#allocation2 + $0x168] sm:$0xff]  ;;  %v233_v37 = vld [vmem:[#allocation2 + $0x160] sm:$0xff]  ;;  %v232_v38 = vld [vmem:[#allocation2 + $0x158] sm:$0xff] }
  0x1b   :  { %1205 = vmatpush3.msra.mxu0 %v40_v9  ;;  %1240 = vmatpush3.msra.mxu1 %v135_v14  ;;  %v231_v39 = vld [vmem:[#allocation2 + $0x150] sm:$0xff]  ;;  %v230_v40 = vld [vmem:[#allocation2 + $0x148] sm:$0xff]  ;;  %v229_v41 = vld [vmem:[#allocation2 + $0x140] sm:$0xff] }
  0x1c   :  { %1206 = vmatprep.subr.mxu0 %v1597_v0  ;;  %1241 = vmatprep.subr.mxu1 %v1597_v0  ;;  %v228_v42 = vld [vmem:[#allocation2 + $0x138] sm:$0xff]  ;;  %v227_v43 = vld [vmem:[#allocation2 + $0x130] sm:$0xff]  ;;  %v226_v44 = vld [vmem:[#allocation2 + $0x128] sm:$0xff] }
  0x1d   :  { %1207 = vmatpush3.msra.mxu0 %v39_v11  ;;  %1242 = vmatpush3.msra.mxu1 %v134_v16  ;;  %v225_v45 = vld [vmem:[#allocation2 + $0x120] sm:$0xff]  ;;  %v224_v46 = vld [vmem:[#allocation2 + $0x118] sm:$0xff]  ;;  %v223_v52 = vld [vmem:[#allocation2 + $0x110] sm:$0xff] }
  0x1e   :  { %1208 = vmatprep.subr.mxu0 %v1597_v0  ;;  %1243 = vmatprep.subr.mxu1 %v1597_v0  ;;  %v1005_v47 = vld [vmem:[%s1848_s2] ss:$0 sm:$0xff]  ;;  %v222_v53 = vld [vmem:[#allocation2 + $0x108] sm:$0xff]  ;;  %v332_v55 = vld [vmem:[#allocation2 + $0x1f8] sm:$0xff] }
  0x1f   :  { %1209 = vmatpush3.msra.mxu0 %v38_v13  ;;  %1244 = vmatpush3.msra.mxu1 %v133_v18  ;;  %v221_v54 = vld [vmem:[#allocation2 + $0x100] sm:$0xff]  ;;  %v331_v56 = vld [vmem:[#allocation2 + $0x1f0] sm:$0xff]  ;;  %v330_v57 = vld [vmem:[#allocation2 + $0x1e8] sm:$0xff] }
  0x20   :  { %1210 = vmatprep.subr.mxu0 %v1597_v0  ;;  %1245 = vmatprep.subr.mxu1 %v1597_v0  ;;  %v329_v58 = vld [vmem:[#allocation2 + $0x1e0] sm:$0xff]  ;;  %v328_v59 = vld [vmem:[#allocation2 + $0x1d8] sm:$0xff]  ;;  %v327_v60 = vld [vmem:[#allocation2 + $0x1d0] sm:$0xff] }
  0x21   :  { %1211 = vmatpush3.msra.mxu0 %v37_v15  ;;  %1246 = vmatpush3.msra.mxu1 %v132_v20  ;;  %v326_v61 = vld [vmem:[#allocation2 + $0x1c8] sm:$0xff]  ;;  %v325_v62 = vld [vmem:[#allocation2 + $0x1c0] sm:$0xff]  ;;  %v324_v63 = vld [vmem:[#allocation2 + $0x1b8] sm:$0xff] }
  0x22   :  { %1212 = vmatprep.subr.mxu0 %v1597_v0  ;;  %1247 = vmatprep.subr.mxu1 %v1597_v0  ;;  %v323_v1 = vld [vmem:[#allocation2 + $0x1b0] sm:$0xff]  ;;  %v322_v2 = vld [vmem:[#allocation2 + $0x1a8] sm:$0xff]  ;;  %v321_v3 = vld [vmem:[#allocation2 + $0x1a0] sm:$0xff] }
  0x23   :  { %1213 = vmatpush3.msra.mxu0 %v36_v17  ;;  %1248 = vmatpush3.msra.mxu1 %v131_v22  ;;  %v320_v4 = vld [vmem:[#allocation2 + $0x198] sm:$0xff]  ;;  %v1007_v5 = vld [vmem:[%s1848_s2 + $0x1] ss:$0 sm:$0xff]  ;;  %v319_v10 = vld [vmem:[#allocation2 + $0x190] sm:$0xff] }
  0x24   :  { %1214 = vmatprep.subr.mxu0 %v1597_v0  ;;  %1249 = vmatprep.subr.mxu1 %v1597_v0  ;;  %v318_v11 = vld [vmem:[#allocation2 + $0x188] sm:$0xff]  ;;  %v317_v12 = vld [vmem:[#allocation2 + $0x180] sm:$0xff]  ;;  %v428_v13 = vld [vmem:[#allocation2 + $0x278] sm:$0xff] }
  0x25   :  { %1215 = vmatpush3.msra.mxu0 %v35_v19  ;;  %1250 = vmatpush3.msra.mxu1 %v130_v24  ;;  %v427_v14 = vld [vmem:[#allocation2 + $0x270] sm:$0xff]  ;;  %v426_v15 = vld [vmem:[#allocation2 + $0x268] sm:$0xff]  ;;  %v425_v16 = vld [vmem:[#allocation2 + $0x260] sm:$0xff] }
  0x26   :  { %1216 = vmatprep.subr.mxu0 %v1597_v0  ;;  %1251 = vmatprep.subr.mxu1 %v1597_v0  ;;  %v424_v17 = vld [vmem:[#allocation2 + $0x258] sm:$0xff]  ;;  %v423_v18 = vld [vmem:[#allocation2 + $0x250] sm:$0xff]  ;;  %v422_v19 = vld [vmem:[#allocation2 + $0x248] sm:$0xff] }
  0x27   :  { %1217 = vmatpush3.msra.mxu0 %v34_v21  ;;  %1252 = vmatpush3.msra.mxu1 %v129_v26  ;;  %v421_v20 = vld [vmem:[#allocation2 + $0x240] sm:$0xff]  ;;  %v420_v21 = vld [vmem:[#allocation2 + $0x238] sm:$0xff]  ;;  %v419_v22 = vld [vmem:[#allocation2 + $0x230] sm:$0xff] }
  0x28   :  { %1218 = vmatprep.subr.mxu0 %v1597_v0  ;;  %1253 = vmatprep.subr.mxu1 %v1597_v0  ;;  %v417_v24 = vld [vmem:[#allocation2 + $0x220] sm:$0xff] }
  0x29   :  { %1219 = vmatpush3.msra.mxu0 %v33_v23  ;;  %1254 = vmatpush3.msra.mxu1 %v128_v28  ;;  %v418_v23 = vld [vmem:[#allocation2 + $0x228] sm:$0xff]  ;;  %v1009_v26 = vld [vmem:[%s1848_s2 + $0x2] ss:$0 sm:$0xff] }
  0x2a   :  { %1220 = vmatprep.subr.mxu0 %v1597_v0  ;;  %1255 = vmatprep.subr.mxu1 %v1597_v0 }
  0x2b   :  { %1221 = vmatpush3.msra.mxu0 %v32_v25  ;;  %1256 = vmatpush3.msra.mxu1 %v127_v31  ;;  %v416_v25 = vld [vmem:[#allocation2 + $0x218] sm:$0xff]  ;;  %v415_v31 = vld [vmem:[#allocation2 + $0x210] sm:$0xff] }
  0x2c   :  { %1222 = vmatprep.subr.mxu0 %v1597_v0  ;;  %1257 = vmatprep.subr.mxu1 %v1597_v0 }
  0x2d   :  { %1223 = vmatpush3.msra.mxu0 %v31_v27  ;;  %1258 = vmatpush3.msra.mxu1 %v126_v32  ;;  %v414_v32 = vld [vmem:[#allocation2 + $0x208] sm:$0xff] }
  0x2e   :  { %1224 = vmatprep.subr.mxu0 %v1597_v0  ;;  %1259 = vmatprep.subr.mxu1 %v1597_v0 }
  0x2f   :  { %1225 = vmatpush3.msra.mxu0 %v30_v29  ;;  %1260 = vmatpush3.msra.mxu1 %v125_v33  ;;  %v413_v33 = vld [vmem:[#allocation2 + $0x200] sm:$0xff] }
  0x30   :  { %1227 = vmatmul.mubr.f32.vlgmr.msra.gmra.mxu0 %v29_v30  ;;  %1264 = vmatprep.subr.mxu0 %v1597_v0 }
  0x31   :  { %1296 = vmatprep.mubr.msk.f32.mxu0 %vm1598_vm0, %v1597_v0  ;;  %1299 = vmatprep.subr.mxu1 %v1597_v0 }
  0x32   :  { %1265 = vmatpush3.msra.mxu0 %v236_v34  ;;  %v525_v34 = vld [vmem:[#allocation2 + $0x2f8] sm:$0xff] }
  0x33   :  { %1266 = vmatprep.subr.mxu0 %v1597_v0 }
  0x34   :  { %1267 = vmatpush3.msra.mxu0 %v235_v35  ;;  %v524_v35 = vld [vmem:[#allocation2 + $0x2f0] sm:$0xff] }
  0x35   :  { %1268 = vmatprep.subr.mxu0 %v1597_v0 }
  0x36   :  { %1269 = vmatpush3.msra.mxu0 %v234_v36  ;;  %v523_v36 = vld [vmem:[#allocation2 + $0x2e8] sm:$0xff] }
  0x37   :  { %1270 = vmatprep.subr.mxu0 %v1597_v0 }
  0x38   :  { %1271 = vmatpush3.msra.mxu0 %v233_v37  ;;  %v522_v37 = vld [vmem:[#allocation2 + $0x2e0] sm:$0xff] }
  0x39   :  { %1272 = vmatprep.subr.mxu0 %v1597_v0 }
  0x3a   :  { %1273 = vmatpush3.msra.mxu0 %v232_v38  ;;  %v521_v38 = vld [vmem:[#allocation2 + $0x2d8] sm:$0xff] }
  0x3b   :  { %1274 = vmatprep.subr.mxu0 %v1597_v0 }
  0x3c   :  { %1275 = vmatpush3.msra.mxu0 %v231_v39  ;;  %v520_v39 = vld [vmem:[#allocation2 + $0x2d0] sm:$0xff] }
  0x3d   :  { %1276 = vmatprep.subr.mxu0 %v1597_v0 }
  0x3e   :  { %1277 = vmatpush3.msra.mxu0 %v230_v40  ;;  %v519_v40 = vld [vmem:[#allocation2 + $0x2c8] sm:$0xff] }
  0x3f   :  { %1278 = vmatprep.subr.mxu0 %v1597_v0 }
  0x40   :  { %1279 = vmatpush3.msra.mxu0 %v229_v41  ;;  %v518_v41 = vld [vmem:[#allocation2 + $0x2c0] sm:$0xff] }
  0x41   :  { %1280 = vmatprep.subr.mxu0 %v1597_v0 }
  0x42   :  { %1281 = vmatpush3.msra.mxu0 %v228_v42  ;;  %v517_v42 = vld [vmem:[#allocation2 + $0x2b8] sm:$0xff] }
  0x43   :  { %1282 = vmatprep.subr.mxu0 %v1597_v0 }
  0x44   :  { %1283 = vmatpush3.msra.mxu0 %v227_v43  ;;  %v516_v43 = vld [vmem:[#allocation2 + $0x2b0] sm:$0xff] }
  0x45   :  { %1284 = vmatprep.subr.mxu0 %v1597_v0 }
  0x46   :  { %1285 = vmatpush3.msra.mxu0 %v226_v44  ;;  %v515_v44 = vld [vmem:[#allocation2 + $0x2a8] sm:$0xff] }
  0x47   :  { %1286 = vmatprep.subr.mxu0 %v1597_v0 }
  0x48   :  { %1287 = vmatpush3.msra.mxu0 %v225_v45  ;;  %v514_v45 = vld [vmem:[#allocation2 + $0x2a0] sm:$0xff] }
  0x49   :  { %1288 = vmatprep.subr.mxu0 %v1597_v0 }
  0x4a   :  { %1289 = vmatpush3.msra.mxu0 %v224_v46  ;;  %v1011_v46 = vld [vmem:[%s1848_s2 + $0x3] ss:$0 sm:$0xff] }
  0x4b   :  { %1290 = vmatprep.subr.mxu0 %v1597_v0 }
  0x4c   :  { %1291 = vmatpush3.msra.mxu0 %v223_v52  ;;  %v512_v52 = vld [vmem:[#allocation2 + $0x290] sm:$0xff] }
  0x4d   :  { %1292 = vmatprep.subr.mxu0 %v1597_v0 }
  0x4e   :  { %1293 = vmatpush3.msra.mxu0 %v222_v53  ;;  %v511_v53 = vld [vmem:[#allocation2 + $0x288] sm:$0xff] }
  0x4f   :  { %1294 = vmatprep.subr.mxu0 %v1597_v0 }
  0x50   :  { %1295 = vmatpush3.msra.mxu0 %v221_v54  ;;  %v510_v54 = vld [vmem:[#allocation2 + $0x280] sm:$0xff] }
  0x51   :  { %1334 = vmatprep.subr.mxu0 %v1597_v0 }
  0xf0   :  { %v119_v48 = vpop.f32.mrf.mxu0 }
  0xf1   :  { %v120_v49 = vadd.f32 %v1005_v47, %v119_v48 }
  0xf2   :  { %v1228_v50 = vpop.f32.mrf.mxu0 }
  0xf3   :  { %v123_v51 = vmax.f32 %v120_v49, 0.0 }
  0xf5   :  { %1262 = vmatmul.mubr.f32.vlgmr.msra.gmra.mxu1 %v123_v51  ;;  %v513_v51 = vld [vmem:[#allocation2 + $0x298] sm:$0xff] }
  0xf6   :  { %1331 = vmatprep.mubr.msk.f32.mxu1 %vm1598_vm0, %v1597_v0  ;;  %1300 = vmatpush3.msra.mxu1 %v332_v55  ;;  %v621_v55 = vld [vmem:[#allocation2 + $0x378] sm:$0xff] }
  0xf7   :  { %1301 = vmatprep.subr.mxu1 %v1597_v0 }
  0xf8   :  { %1302 = vmatpush3.msra.mxu1 %v331_v56  ;;  %v620_v56 = vld [vmem:[#allocation2 + $0x370] sm:$0xff] }
  0xf9   :  { %1303 = vmatprep.subr.mxu1 %v1597_v0 }
  0xfa   :  { %1304 = vmatpush3.msra.mxu1 %v330_v57  ;;  %v619_v57 = vld [vmem:[#allocation2 + $0x368] sm:$0xff] }
  0xfb   :  { %1305 = vmatprep.subr.mxu1 %v1597_v0 }
  0xfc   :  { %1306 = vmatpush3.msra.mxu1 %v329_v58  ;;  %v618_v58 = vld [vmem:[#allocation2 + $0x360] sm:$0xff] }
  0xfd   :  { %1307 = vmatprep.subr.mxu1 %v1597_v0 }
  0xfe   :  { %1308 = vmatpush3.msra.mxu1 %v328_v59  ;;  %v617_v59 = vld [vmem:[#allocation2 + $0x358] sm:$0xff] }
  0xff   :  { %1309 = vmatprep.subr.mxu1 %v1597_v0 }
 0x100   :  { %1310 = vmatpush3.msra.mxu1 %v327_v60  ;;  %v616_v60 = vld [vmem:[#allocation2 + $0x350] sm:$0xff] }
 0x101   :  { %1311 = vmatprep.subr.mxu1 %v1597_v0 }
 0x102   :  { %1312 = vmatpush3.msra.mxu1 %v326_v61  ;;  %v615_v61 = vld [vmem:[#allocation2 + $0x348] sm:$0xff] }
 0x103   :  { %1313 = vmatprep.subr.mxu1 %v1597_v0 }
 0x104   :  { %1314 = vmatpush3.msra.mxu1 %v325_v62  ;;  %v614_v62 = vld [vmem:[#allocation2 + $0x340] sm:$0xff] }
 0x105   :  { %1315 = vmatprep.subr.mxu1 %v1597_v0 }
 0x106   :  { %1316 = vmatpush3.msra.mxu1 %v324_v63  ;;  %v613_v63 = vld [vmem:[#allocation2 + $0x338] sm:$0xff] }
 0x107   :  { %1317 = vmatprep.subr.mxu1 %v1597_v0 }
 0x108   :  { %1318 = vmatpush3.msra.mxu1 %v323_v1  ;;  %v612_v1 = vld [vmem:[#allocation2 + $0x330] sm:$0xff] }
 0x109   :  { %1319 = vmatprep.subr.mxu1 %v1597_v0 }
 0x10a   :  { %1320 = vmatpush3.msra.mxu1 %v322_v2  ;;  %v611_v2 = vld [vmem:[#allocation2 + $0x328] sm:$0xff] }
 0x10b   :  { %1321 = vmatprep.subr.mxu1 %v1597_v0 }
 0x10c   :  { %1322 = vmatpush3.msra.mxu1 %v321_v3  ;;  %v610_v3 = vld [vmem:[#allocation2 + $0x320] sm:$0xff] }
 0x10d   :  { %1323 = vmatprep.subr.mxu1 %v1597_v0 }
 0x10e   :  { %1324 = vmatpush3.msra.mxu1 %v320_v4  ;;  %v609_v4 = vld [vmem:[#allocation2 + $0x318] sm:$0xff] }
 0x10f   :  { %1325 = vmatprep.subr.mxu1 %v1597_v0 }
 0x110   :  { %1326 = vmatpush3.msra.mxu1 %v319_v10 }
 0x111   :  { %1327 = vmatprep.subr.mxu1 %v1597_v0 }
 0x112   :  { %1328 = vmatpush3.msra.mxu1 %v318_v11 }
 0x113   :  { %1329 = vmatprep.subr.mxu1 %v1597_v0 }
 0x114   :  { %1330 = vmatpush3.msra.mxu1 %v317_v12 }
 0x115   :  { %1369 = vmatprep.subr.mxu1 %v1597_v0 }
 0x1b5   :  { %v215_v6 = vpop.f32.mrf.mxu1 }
 0x1b6   :  { %v1703_v7 = vadd.f32 %v1007_v5, %v215_v6  ;;  %v1013_v5 = vld [vmem:[%s1848_s2 + $0x4] ss:$0 sm:$0xff] }
 0x1b7   :  { %v1263_v8 = vpop.f32.mrf.mxu1 }
 0x1b8   :  { %v219_v9 = vmax.f32 %v1703_v7, 0.0  ;;  %v908_v7 = vld [vmem:[#allocation2 + $0x4e8] sm:$0xff] }
 0x1ba   :  { %1297 = vmatmul.mubr.f32.vlgmr.msra.gmra.mxu0 %v219_v9 }
 0x1bb   :  { %1366 = vmatprep.mubr.msk.f32.mxu0 %vm1598_vm0, %v1597_v0  ;;  %1335 = vmatpush3.msra.mxu0 %v428_v13  ;;  %v608_v13 = vld [vmem:[#allocation2 + $0x310] sm:$0xff] }
 0x1bc   :  { %1336 = vmatprep.subr.mxu0 %v1597_v0 }
 0x1bd   :  { %1337 = vmatpush3.msra.mxu0 %v427_v14  ;;  %v607_v14 = vld [vmem:[#allocation2 + $0x308] sm:$0xff] }
 0x1be   :  { %1338 = vmatprep.subr.mxu0 %v1597_v0 }
 0x1bf   :  { %1339 = vmatpush3.msra.mxu0 %v426_v15  ;;  %v606_v15 = vld [vmem:[#allocation2 + $0x300] sm:$0xff] }
 0x1c0   :  { %1340 = vmatprep.subr.mxu0 %v1597_v0 }
 0x1c1   :  { %1341 = vmatpush3.msra.mxu0 %v425_v16  ;;  %v718_v16 = vld [vmem:[#allocation2 + $0x3f8] sm:$0xff] }
 0x1c2   :  { %1342 = vmatprep.subr.mxu0 %v1597_v0 }
 0x1c3   :  { %1343 = vmatpush3.msra.mxu0 %v424_v17  ;;  %v717_v17 = vld [vmem:[#allocation2 + $0x3f0] sm:$0xff] }
 0x1c4   :  { %1344 = vmatprep.subr.mxu0 %v1597_v0 }
 0x1c5   :  { %1345 = vmatpush3.msra.mxu0 %v423_v18  ;;  %v716_v18 = vld [vmem:[#allocation2 + $0x3e8] sm:$0xff] }
 0x1c6   :  { %1346 = vmatprep.subr.mxu0 %v1597_v0 }
 0x1c7   :  { %1347 = vmatpush3.msra.mxu0 %v422_v19  ;;  %v715_v19 = vld [vmem:[#allocation2 + $0x3e0] sm:$0xff] }
 0x1c8   :  { %1348 = vmatprep.subr.mxu0 %v1597_v0 }
 0x1c9   :  { %1349 = vmatpush3.msra.mxu0 %v421_v20  ;;  %v714_v20 = vld [vmem:[#allocation2 + $0x3d8] sm:$0xff] }
 0x1ca   :  { %1350 = vmatprep.subr.mxu0 %v1597_v0 }
 0x1cb   :  { %1351 = vmatpush3.msra.mxu0 %v420_v21  ;;  %v713_v21 = vld [vmem:[#allocation2 + $0x3d0] sm:$0xff] }
 0x1cc   :  { %1352 = vmatprep.subr.mxu0 %v1597_v0 }
 0x1cd   :  { %1353 = vmatpush3.msra.mxu0 %v419_v22  ;;  %v712_v22 = vld [vmem:[#allocation2 + $0x3c8] sm:$0xff] }
 0x1ce   :  { %1354 = vmatprep.subr.mxu0 %v1597_v0 }
 0x1cf   :  { %1355 = vmatpush3.msra.mxu0 %v418_v23  ;;  %v711_v23 = vld [vmem:[#allocation2 + $0x3c0] sm:$0xff] }
 0x1d0   :  { %1356 = vmatprep.subr.mxu0 %v1597_v0 }
 0x1d1   :  { %1357 = vmatpush3.msra.mxu0 %v417_v24  ;;  %v710_v24 = vld [vmem:[#allocation2 + $0x3b8] sm:$0xff] }
 0x1d2   :  { %1358 = vmatprep.subr.mxu0 %v1597_v0 }
 0x1d3   :  { %1359 = vmatpush3.msra.mxu0 %v416_v25  ;;  %v709_v25 = vld [vmem:[#allocation2 + $0x3b0] sm:$0xff] }
 0x1d4   :  { %1360 = vmatprep.subr.mxu0 %v1597_v0 }
 0x1d5   :  { %1361 = vmatpush3.msra.mxu0 %v415_v31 }
 0x1d6   :  { %1362 = vmatprep.subr.mxu0 %v1597_v0 }
 0x1d7   :  { %1363 = vmatpush3.msra.mxu0 %v414_v32 }
 0x1d8   :  { %1364 = vmatprep.subr.mxu0 %v1597_v0 }
 0x1d9   :  { %1365 = vmatpush3.msra.mxu0 %v413_v33  ;;  %v706_v33 = vld [vmem:[#allocation2 + $0x398] sm:$0xff] }
 0x1da   :  { %1404 = vmatprep.subr.mxu0 %v1597_v0 }
 0x27a   :  { %v311_v27 = vpop.f32.mrf.mxu0 }
 0x27b   :  { %v312_v28 = vadd.f32 %v1009_v26, %v311_v27  ;;  %v708_v26 = vld [vmem:[#allocation2 + $0x3a8] sm:$0xff]  ;;  %v707_v27 = vld [vmem:[#allocation2 + $0x3a0] sm:$0xff] }
 0x27c   :  { %v1298_v29 = vpop.f32.mrf.mxu0 }
 0x27d   :  { %v315_v30 = vmax.f32 %v312_v28, 0.0  ;;  %v1015_v28 = vld [vmem:[%s1848_s2 + $0x5] ss:$0 sm:$0xff] }
 0x27f   :  { %1332 = vmatmul.mubr.f32.vlgmr.msra.gmra.mxu1 %v315_v30 }
 0x280   :  { %1401 = vmatprep.mubr.msk.f32.mxu1 %vm1598_vm0, %v1597_v0  ;;  %1370 = vmatpush3.msra.mxu1 %v525_v34  ;;  %v705_v34 = vld [vmem:[#allocation2 + $0x390] sm:$0xff] }
 0x281   :  { %1371 = vmatprep.subr.mxu1 %v1597_v0 }
 0x282   :  { %1372 = vmatpush3.msra.mxu1 %v524_v35  ;;  %v704_v35 = vld [vmem:[#allocation2 + $0x388] sm:$0xff] }
 0x283   :  { %1373 = vmatprep.subr.mxu1 %v1597_v0 }
 0x284   :  { %1374 = vmatpush3.msra.mxu1 %v523_v36  ;;  %v703_v36 = vld [vmem:[#allocation2 + $0x380] sm:$0xff] }
 0x285   :  { %1375 = vmatprep.subr.mxu1 %v1597_v0 }
 0x286   :  { %1376 = vmatpush3.msra.mxu1 %v522_v37  ;;  %v814_v37 = vld [vmem:[#allocation2 + $0x478] sm:$0xff] }
 0x287   :  { %1377 = vmatprep.subr.mxu1 %v1597_v0 }
 0x288   :  { %1378 = vmatpush3.msra.mxu1 %v521_v38  ;;  %v813_v38 = vld [vmem:[#allocation2 + $0x470] sm:$0xff] }
 0x289   :  { %1379 = vmatprep.subr.mxu1 %v1597_v0 }
 0x28a   :  { %1380 = vmatpush3.msra.mxu1 %v520_v39  ;;  %v812_v39 = vld [vmem:[#allocation2 + $0x468] sm:$0xff] }
 0x28b   :  { %1381 = vmatprep.subr.mxu1 %v1597_v0 }
 0x28c   :  { %1382 = vmatpush3.msra.mxu1 %v519_v40  ;;  %v811_v40 = vld [vmem:[#allocation2 + $0x460] sm:$0xff] }
 0x28d   :  { %1383 = vmatprep.subr.mxu1 %v1597_v0 }
 0x28e   :  { %1384 = vmatpush3.msra.mxu1 %v518_v41  ;;  %v810_v41 = vld [vmem:[#allocation2 + $0x458] sm:$0xff] }
 0x28f   :  { %1385 = vmatprep.subr.mxu1 %v1597_v0 }
 0x290   :  { %1386 = vmatpush3.msra.mxu1 %v517_v42  ;;  %v809_v42 = vld [vmem:[#allocation2 + $0x450] sm:$0xff] }
 0x291   :  { %1387 = vmatprep.subr.mxu1 %v1597_v0 }
 0x292   :  { %1388 = vmatpush3.msra.mxu1 %v516_v43  ;;  %v808_v43 = vld [vmem:[#allocation2 + $0x448] sm:$0xff] }
 0x293   :  { %1389 = vmatprep.subr.mxu1 %v1597_v0 }
 0x294   :  { %1390 = vmatpush3.msra.mxu1 %v515_v44  ;;  %v807_v44 = vld [vmem:[#allocation2 + $0x440] sm:$0xff] }
 0x295   :  { %1391 = vmatprep.subr.mxu1 %v1597_v0 }
 0x296   :  { %1392 = vmatpush3.msra.mxu1 %v514_v45  ;;  %v806_v45 = vld [vmem:[#allocation2 + $0x438] sm:$0xff] }
 0x297   :  { %1393 = vmatprep.subr.mxu1 %v1597_v0 }
 0x298   :  { %1394 = vmatpush3.msra.mxu1 %v513_v51 }
 0x299   :  { %1395 = vmatprep.subr.mxu1 %v1597_v0 }
 0x29a   :  { %1396 = vmatpush3.msra.mxu1 %v512_v52 }
 0x29b   :  { %1397 = vmatprep.subr.mxu1 %v1597_v0 }
 0x29c   :  { %1398 = vmatpush3.msra.mxu1 %v511_v53 }
 0x29d   :  { %1399 = vmatprep.subr.mxu1 %v1597_v0 }
 0x29e   :  { %1400 = vmatpush3.msra.mxu1 %v510_v54 }
 0x29f   :  { %1439 = vmatprep.subr.mxu1 %v1597_v0 }
 0x33f   :  { %v407_v47 = vpop.f32.mrf.mxu1 }
 0x340   :  { %v408_v48 = vadd.f32 %v1011_v46, %v407_v47  ;;  %v805_v46 = vld [vmem:[#allocation2 + $0x430] sm:$0xff]  ;;  %v804_v47 = vld [vmem:[#allocation2 + $0x428] sm:$0xff] }
 0x341   :  { %v1333_v49 = vpop.f32.mrf.mxu1 }
 0x342   :  { %v411_v50 = vmax.f32 %v408_v48, 0.0  ;;  %v803_v48 = vld [vmem:[#allocation2 + $0x420] sm:$0xff]  ;;  %v802_v49 = vld [vmem:[#allocation2 + $0x418] sm:$0xff] }
 0x344   :  { %1367 = vmatmul.mubr.f32.vlgmr.msra.gmra.mxu0 %v411_v50 }
 0x345   :  { %1436 = vmatprep.mubr.msk.f32.mxu0 %vm1598_vm0, %v1597_v0  ;;  %1405 = vmatpush3.msra.mxu0 %v621_v55 }
 0x346   :  { %1406 = vmatprep.subr.mxu0 %v1597_v0 }
 0x347   :  { %1407 = vmatpush3.msra.mxu0 %v620_v56  ;;  %v801_v56 = vld [vmem:[#allocation2 + $0x410] sm:$0xff] }
 0x348   :  { %1408 = vmatprep.subr.mxu0 %v1597_v0 }
 0x349   :  { %1409 = vmatpush3.msra.mxu0 %v619_v57  ;;  %v800_v57 = vld [vmem:[#allocation2 + $0x408] sm:$0xff] }
 0x34a   :  { %1410 = vmatprep.subr.mxu0 %v1597_v0 }
 0x34b   :  { %1411 = vmatpush3.msra.mxu0 %v618_v58  ;;  %v799_v58 = vld [vmem:[#allocation2 + $0x400] sm:$0xff] }
 0x34c   :  { %1412 = vmatprep.subr.mxu0 %v1597_v0 }
 0x34d   :  { %1413 = vmatpush3.msra.mxu0 %v617_v59  ;;  %v910_v59 = vld [vmem:[#allocation2 + $0x4f8] sm:$0xff] }
 0x34e   :  { %1414 = vmatprep.subr.mxu0 %v1597_v0 }
 0x34f   :  { %1415 = vmatpush3.msra.mxu0 %v616_v60  ;;  %v909_v60 = vld [vmem:[#allocation2 + $0x4f0] sm:$0xff] }
 0x350   :  { %1416 = vmatprep.subr.mxu0 %v1597_v0 }
 0x351   :  { %1417 = vmatpush3.msra.mxu0 %v615_v61  ;;  %v906_v61 = vld [vmem:[#allocation2 + $0x4d8] sm:$0xff] }
 0x352   :  { %1418 = vmatprep.subr.mxu0 %v1597_v0 }
 0x353   :  { %1419 = vmatpush3.msra.mxu0 %v614_v62  ;;  %v905_v62 = vld [vmem:[#allocation2 + $0x4d0] sm:$0xff] }
 0x354   :  { %1420 = vmatprep.subr.mxu0 %v1597_v0 }
 0x355   :  { %1421 = vmatpush3.msra.mxu0 %v613_v63  ;;  %v904_v63 = vld [vmem:[#allocation2 + $0x4c8] sm:$0xff] }
 0x356   :  { %1422 = vmatprep.subr.mxu0 %v1597_v0 }
 0x357   :  { %1423 = vmatpush3.msra.mxu0 %v612_v1  ;;  %v903_v1 = vld [vmem:[#allocation2 + $0x4c0] sm:$0xff] }
 0x358   :  { %1424 = vmatprep.subr.mxu0 %v1597_v0 }
 0x359   :  { %1425 = vmatpush3.msra.mxu0 %v611_v2  ;;  %v902_v2 = vld [vmem:[#allocation2 + $0x4b8] sm:$0xff] }
 0x35a   :  { %1426 = vmatprep.subr.mxu0 %v1597_v0 }
 0x35b   :  { %1427 = vmatpush3.msra.mxu0 %v610_v3  ;;  %v901_v3 = vld [vmem:[#allocation2 + $0x4b0] sm:$0xff] }
 0x35c   :  { %1428 = vmatprep.subr.mxu0 %v1597_v0 }
 0x35d   :  { %1429 = vmatpush3.msra.mxu0 %v609_v4  ;;  %v900_v4 = vld [vmem:[#allocation2 + $0x4a8] sm:$0xff] }
 0x35e   :  { %1430 = vmatprep.subr.mxu0 %v1597_v0 }
 0x35f   :  { %1431 = vmatpush3.msra.mxu0 %v608_v13 }
 0x360   :  { %1432 = vmatprep.subr.mxu0 %v1597_v0 }
 0x361   :  { %1433 = vmatpush3.msra.mxu0 %v607_v14  ;;  %v897_v14 = vld [vmem:[#allocation2 + $0x490] sm:$0xff] }
 0x362   :  { %1434 = vmatprep.subr.mxu0 %v1597_v0 }
 0x363   :  { %1435 = vmatpush3.msra.mxu0 %v606_v15  ;;  %v896_v15 = vld [vmem:[#allocation2 + $0x488] sm:$0xff] }
 0x364   :  { %1474 = vmatprep.subr.mxu0 %v1597_v0 }
 0x404   :  { %v503_v6 = vpop.f32.mrf.mxu0 }
 0x405   :  { %v504_v8 = vadd.f32 %v1013_v5, %v503_v6  ;;  %v899_v5 = vld [vmem:[#allocation2 + $0x4a0] sm:$0xff]  ;;  %v898_v6 = vld [vmem:[#allocation2 + $0x498] sm:$0xff] }
 0x406   :  { %v1368_v10 = vpop.f32.mrf.mxu0 }
 0x407   :  { %v507_v11 = vmax.f32 %v504_v8, 0.0  ;;  %v1019_v8 = vld [vmem:[%s1848_s2 + $0x7] ss:$0 sm:$0xff] }
 0x409   :  { %v508_v12 = vadd.f32 %v507_v11, %v411_v50  ;;  %v1017_v50 = vld [vmem:[%s1848_s2 + $0x6] ss:$0 sm:$0xff] }
 0x40b   :  { %1402 = vmatmul.mubr.f32.vlgmr.msra.gmra.mxu1 %v508_v12 }
 0x40c   :  { %1471 = vmatprep.mubr.msk.f32.mxu1 %vm1598_vm0, %v1597_v0  ;;  %1440 = vmatpush3.msra.mxu1 %v718_v16  ;;  %v895_v16 = vld [vmem:[#allocation2 + $0x480] sm:$0xff] }
 0x40d   :  { %1441 = vmatprep.subr.mxu1 %v1597_v0 }
 0x40e   :  { %1442 = vmatpush3.msra.mxu1 %v717_v17  ;;  %v1021_v17 = vld [vmem:[%s1848_s2 + $0x8] ss:$0 sm:$0xff] }
 0x40f   :  { %1443 = vmatprep.subr.mxu1 %v1597_v0 }
 0x410   :  { %1444 = vmatpush3.msra.mxu1 %v716_v18 }
 0x411   :  { %1445 = vmatprep.subr.mxu1 %v1597_v0 }
 0x412   :  { %1446 = vmatpush3.msra.mxu1 %v715_v19 }
 0x413   :  { %1447 = vmatprep.subr.mxu1 %v1597_v0 }
 0x414   :  { %1448 = vmatpush3.msra.mxu1 %v714_v20 }
 0x415   :  { %1449 = vmatprep.subr.mxu1 %v1597_v0 }
 0x416   :  { %1450 = vmatpush3.msra.mxu1 %v713_v21 }
 0x417   :  { %1451 = vmatprep.subr.mxu1 %v1597_v0 }
 0x418   :  { %1452 = vmatpush3.msra.mxu1 %v712_v22  ;;  %v1023_v22 = vld [vmem:[%s1848_s2 + $0x9] ss:$0 sm:$0xff] }
 0x419   :  { %1453 = vmatprep.subr.mxu1 %v1597_v0 }
 0x41a   :  { %1454 = vmatpush3.msra.mxu1 %v711_v23 }
 0x41b   :  { %1455 = vmatprep.subr.mxu1 %v1597_v0 }
 0x41c   :  { %1456 = vmatpush3.msra.mxu1 %v710_v24 }
 0x41d   :  { %1457 = vmatprep.subr.mxu1 %v1597_v0 }
 0x41e   :  { %1458 = vmatpush3.msra.mxu1 %v709_v25 }
 0x41f   :  { %1459 = vmatprep.subr.mxu1 %v1597_v0 }
 0x420   :  { %1460 = vmatpush3.msra.mxu1 %v708_v26 }
 0x421   :  { %1461 = vmatprep.subr.mxu1 %v1597_v0 }
 0x422   :  { %1462 = vmatpush3.msra.mxu1 %v707_v27 }
 0x423   :  { %1463 = vmatprep.subr.mxu1 %v1597_v0 }
 0x424   :  { %1464 = vmatpush3.msra.mxu1 %v706_v33 }
 0x425   :  { %1465 = vmatprep.subr.mxu1 %v1597_v0 }
 0x426   :  { %1466 = vmatpush3.msra.mxu1 %v705_v34 }
 0x427   :  { %1467 = vmatprep.subr.mxu1 %v1597_v0 }
 0x428   :  { %1468 = vmatpush3.msra.mxu1 %v704_v35 }
 0x429   :  { %1469 = vmatprep.subr.mxu1 %v1597_v0 }
 0x42a   :  { %1470 = vmatpush3.msra.mxu1 %v703_v36 }
 0x42b   :  { %1509 = vmatprep.subr.mxu1 %v1597_v0 }
 0x4cb   :  { %v600_v29 = vpop.f32.mrf.mxu1 }
 0x4cc   :  { %v601_v30 = vadd.f32 %v1015_v28, %v600_v29 }
 0x4cd   :  { %v1403_v31 = vpop.f32.mrf.mxu1 }
 0x4ce   :  { %v604_v32 = vmax.f32 %v601_v30, 0.0 }
 0x4d0   :  { %1437 = vmatmul.mubr.f32.vlgmr.msra.gmra.mxu0 %v604_v32 }
 0x4d1   :  { %1506 = vmatprep.mubr.msk.f32.mxu0 %vm1598_vm0, %v1597_v0  ;;  %1475 = vmatpush3.msra.mxu0 %v814_v37 }
 0x4d2   :  { %1476 = vmatprep.subr.mxu0 %v1597_v0 }
 0x4d3   :  { %1477 = vmatpush3.msra.mxu0 %v813_v38 }
 0x4d4   :  { %1478 = vmatprep.subr.mxu0 %v1597_v0 }
 0x4d5   :  { %1479 = vmatpush3.msra.mxu0 %v812_v39 }
 0x4d6   :  { %1480 = vmatprep.subr.mxu0 %v1597_v0 }
 0x4d7   :  { %1481 = vmatpush3.msra.mxu0 %v811_v40 }
 0x4d8   :  { %1482 = vmatprep.subr.mxu0 %v1597_v0 }
 0x4d9   :  { %1483 = vmatpush3.msra.mxu0 %v810_v41 }
 0x4da   :  { %1484 = vmatprep.subr.mxu0 %v1597_v0 }
 0x4db   :  { %1485 = vmatpush3.msra.mxu0 %v809_v42 }
 0x4dc   :  { %1486 = vmatprep.subr.mxu0 %v1597_v0 }
 0x4dd   :  { %1487 = vmatpush3.msra.mxu0 %v808_v43 }
 0x4de   :  { %1488 = vmatprep.subr.mxu0 %v1597_v0 }
 0x4df   :  { %1489 = vmatpush3.msra.mxu0 %v807_v44 }
 0x4e0   :  { %1490 = vmatprep.subr.mxu0 %v1597_v0 }
 0x4e1   :  { %1491 = vmatpush3.msra.mxu0 %v806_v45 }
 0x4e2   :  { %1492 = vmatprep.subr.mxu0 %v1597_v0 }
 0x4e3   :  { %1493 = vmatpush3.msra.mxu0 %v805_v46 }
 0x4e4   :  { %1494 = vmatprep.subr.mxu0 %v1597_v0 }
 0x4e5   :  { %1495 = vmatpush3.msra.mxu0 %v804_v47 }
 0x4e6   :  { %1496 = vmatprep.subr.mxu0 %v1597_v0 }
 0x4e7   :  { %1497 = vmatpush3.msra.mxu0 %v803_v48 }
 0x4e8   :  { %1498 = vmatprep.subr.mxu0 %v1597_v0 }
 0x4e9   :  { %1499 = vmatpush3.msra.mxu0 %v802_v49 }
 0x4ea   :  { %1500 = vmatprep.subr.mxu0 %v1597_v0 }
 0x4eb   :  { %1501 = vmatpush3.msra.mxu0 %v801_v56 }
 0x4ec   :  { %1502 = vmatprep.subr.mxu0 %v1597_v0 }
 0x4ed   :  { %1503 = vmatpush3.msra.mxu0 %v800_v57 }
 0x4ee   :  { %1504 = vmatprep.subr.mxu0 %v1597_v0 }
 0x4ef   :  { %1505 = vmatpush3.msra.mxu0 %v799_v58 }
 0x590   :  { %v696_v51 = vpop.f32.mrf.mxu0 }
 0x591   :  { %v697_v52 = vadd.f32 %v1017_v50, %v696_v51 }
 0x592   :  { %v1438_v53 = vpop.f32.mrf.mxu0 }
 0x593   :  { %v700_v54 = vmax.f32 %v697_v52, 0.0 }
 0x595   :  { %v701_v55 = vadd.f32 %v700_v54, %v219_v9  ;;  %v907_v9 = vld [vmem:[#allocation2 + $0x4e0] sm:$0xff] }
 0x597   :  { %1472 = vmatmul.mubr.f32.vlgmr.msra.gmra.mxu1 %v701_v55 }
 0x598   :  { %1541 = vmatprep.mubr.msk.f32.mxu1 %vm1598_vm0, %v1597_v0  ;;  %1510 = vmatpush3.msra.mxu1 %v910_v59 }
 0x599   :  { %1511 = vmatprep.subr.mxu1 %v1597_v0 }
 0x59a   :  { %1512 = vmatpush3.msra.mxu1 %v909_v60 }
 0x59b   :  { %1513 = vmatprep.subr.mxu1 %v1597_v0 }
 0x59c   :  { %1514 = vmatpush3.msra.mxu1 %v908_v7 }
 0x59d   :  { %1515 = vmatprep.subr.mxu1 %v1597_v0 }
 0x59e   :  { %1516 = vmatpush3.msra.mxu1 %v907_v9 }
 0x59f   :  { %1517 = vmatprep.subr.mxu1 %v1597_v0 }
 0x5a0   :  { %1518 = vmatpush3.msra.mxu1 %v906_v61 }
 0x5a1   :  { %1519 = vmatprep.subr.mxu1 %v1597_v0 }
 0x5a2   :  { %1520 = vmatpush3.msra.mxu1 %v905_v62 }
 0x5a3   :  { %1521 = vmatprep.subr.mxu1 %v1597_v0 }
 0x5a4   :  { %1522 = vmatpush3.msra.mxu1 %v904_v63 }
 0x5a5   :  { %1523 = vmatprep.subr.mxu1 %v1597_v0 }
 0x5a6   :  { %1524 = vmatpush3.msra.mxu1 %v903_v1 }
 0x5a7   :  { %1525 = vmatprep.subr.mxu1 %v1597_v0 }
 0x5a8   :  { %1526 = vmatpush3.msra.mxu1 %v902_v2 }
 0x5a9   :  { %1527 = vmatprep.subr.mxu1 %v1597_v0 }
 0x5aa   :  { %1528 = vmatpush3.msra.mxu1 %v901_v3 }
 0x5ab   :  { %1529 = vmatprep.subr.mxu1 %v1597_v0 }
 0x5ac   :  { %1530 = vmatpush3.msra.mxu1 %v900_v4 }
 0x5ad   :  { %1531 = vmatprep.subr.mxu1 %v1597_v0 }
 0x5ae   :  { %1532 = vmatpush3.msra.mxu1 %v899_v5 }
 0x5af   :  { %1533 = vmatprep.subr.mxu1 %v1597_v0 }
 0x5b0   :  { %1534 = vmatpush3.msra.mxu1 %v898_v6 }
 0x5b1   :  { %1535 = vmatprep.subr.mxu1 %v1597_v0 }
 0x5b2   :  { %1536 = vmatpush3.msra.mxu1 %v897_v14 }
 0x5b3   :  { %1537 = vmatprep.subr.mxu1 %v1597_v0 }
 0x5b4   :  { %1538 = vmatpush3.msra.mxu1 %v896_v15 }
 0x5b5   :  { %1539 = vmatprep.subr.mxu1 %v1597_v0 }
 0x5b6   :  { %1540 = vmatpush3.msra.mxu1 %v895_v16 }
 0x657   :  { %v793_v10 = vpop.f32.mrf.mxu1 }
 0x658   :  { %v794_v11 = vadd.f32 %v1019_v8, %v793_v10 }
 0x659   :  { %v1473_v12 = vpop.f32.mrf.mxu1 }
 0x65a   :  { %v797_v13 = vmax.f32 %v794_v11, 0.0 }
 0x65c   :  { %1507 = vmatmul.mubr.f32.vlgmr.msra.gmra.mxu0 %v797_v13 }
 0x71c   :  { %v889_v18 = vpop.f32.mrf.mxu0 }
 0x71d   :  { %v890_v19 = vadd.f32 %v1021_v17, %v889_v18 }
 0x71e   :  { %v1508_v20 = vpop.f32.mrf.mxu0 }
 0x71f   :  { %v893_v21 = vmax.f32 %v890_v19, 0.0 }
 0x721   :  { %1542 = vmatmul.mubr.f32.vlgmr.msra.gmra.mxu1 %v893_v21 }
 0x7e1   :  { %v985_v23 = vpop.f32.mrf.mxu1 }
 0x7e2   :  { %v986_v24 = vadd.f32 %v1023_v22, %v985_v23 }
 0x7e3   :  { %v1543_v0 = vpop.f32.mrf.mxu1 }
 0x7e4   :  { %989 = vst [vmem:[#allocation5] sm:$0xff] %v986_v24 }
 0x7e5   :  { %1581 = shalt.err (!%p1578_p9)
}
 0x7e6   :  { %999 = dma.vmem_to_hbm [thread:$0]  %s997_s13, 128, %s1849_s3, [#allocation4]  }
 0x7e7   :  { %1592 = dma.done.wait [#allocation4], 128  }
 0x7e8   :  { %1593 = vsyncadd [#allocation4], 4294967168 }
 0x7e9   :  { %1003 = vsyncpa [#allocation3], 1 }
 0x7ea   :  { %1004 = vsyncpa [#allocation4], 1 }

</bundles_post_ra>
